<compile_context>
chip_gen: v6e
topology: v6e:2x2x1
jax: 0.10.0
libtpu: 0.0.40
codegen_flags: <defaults>
</compile_context>

<pallas_src>
import functools

import jax
import jax.numpy as jnp
from jax import lax
from jax.experimental import pallas as pl
from jax.experimental.pallas import tpu as pltpu


# ---------------------------------------------------------------------------
# Helpers
# ---------------------------------------------------------------------------
def _cdiv(a, b):
    return -(-a // b)


def _round_up(x, m):
    return _cdiv(x, m) * m


def _choose_tiling(E, max_tile_e):
    """Pick (tile, n_tiles, e_pad).

    tile is a multiple of 128 (lane-dense output stores); prefer >= 2 grid
    steps and an *even* number of steps (v7x has two TensorCores sharing the
    parallel axis) whenever that costs no extra padded work.
    """
    e128 = _round_up(max(int(E), 1), 128)
    max_tile = _round_up(min(int(max_tile_e), e128), 128)
    n = _cdiv(e128, max_tile)
    if n == 1 and e128 >= 256:
        n = 2                               # allow megacore / 2-TC sharding
    tile = _round_up(_cdiv(e128, n), 128)
    if n > 1 and n % 2:
        tile_even = _round_up(_cdiv(e128, n + 1), 128)
        if (n + 1) * tile_even <= n * tile:  # even split is free -> take it
            n, tile = n + 1, tile_even
    return tile, n, n * tile


# ---------------------------------------------------------------------------
# Kernel
# ---------------------------------------------------------------------------
def _make_kernel(mtype, fuse_k):
    """Edge-MLP kernel body.

    Ref order:
      hs (TE, F), hd (TE, F)                       -- edge endpoint features
      [fuse_k]   w1 (2F, F)                        -- stacked W1^T
      [else]     w1s (F, F), w1d (F, F)            -- W1^T halves
      b1 (1, F) f32
      [rm only]  w2 (F, F), b2 (1, F) f32
      w_last (8, F)  (row 0 real, rows 1..7 zero)
      b_last (1,) f32 in SMEM
      out (1, 1, TE) f32                           -- lane-dense scores
    """

    def kernel(hs_ref, hd_ref, *rest):
        if fuse_k:
            w1_ref, rest = rest[0], rest[1:]
            # Single K=2F pass fills the 256-deep MXU on v6e/v7x.
            x = jnp.concatenate([hs_ref[...], hd_ref[...]], axis=-1)
            z = jnp.dot(x, w1_ref[...], preferred_element_type=jnp.float32)
        else:
            (w1s_ref, w1d_ref), rest = rest[:2], rest[2:]
            z = jnp.dot(hs_ref[...], w1s_ref[...],
                        preferred_element_type=jnp.float32)
            z = z + jnp.dot(hd_ref[...], w1d_ref[...],
                            preferred_element_type=jnp.float32)
        b1_ref, rest = rest[0], rest[1:]
        z = jnp.maximum(z + b1_ref[...], 0.0)

        if mtype == "rm":
            (w2_ref, b2_ref), rest = rest[:2], rest[2:]
            z = jnp.dot(z.astype(w2_ref.dtype), w2_ref[...],
                        preferred_element_type=jnp.float32)
            z = jnp.maximum(z + b2_ref[...], 0.0)

        wl_ref, bl_ref, out_ref = rest
        # Final F -> 1 layer as (8, F) x (TE, F)^T so row 0 of the result is a
        # lane-dense (1, TE) row (unmasked vector stores).  Operands are cast
        # to the matmul input dtype; accumulation stays f32.
        s = lax.dot_general(wl_ref[...], z.astype(wl_ref.dtype),
                            dimension_numbers=(((1,), (1,)), ((), ())),
                            preferred_element_type=jnp.float32)
        out_ref[0] = (s[0:1, :] + bl_ref[0]).astype(out_ref.dtype)

    return kernel


# ---------------------------------------------------------------------------
# Wrapper
# ---------------------------------------------------------------------------
@functools.partial(jax.jit, static_argnames=("mtype", "tile_e", "input_dtype"))
def mlp_predictor_forward(h, src_idx, dst_idx, params, mtype="rm",
                          tile_e=1024, input_dtype=jnp.bfloat16):
    """Edge-score MLP (matches MLPPredictor.forward).

    h:        (N, F) float32 node features
    src_idx:  (E,) int32 source node per edge
    dst_idx:  (E,) int32 destination node per edge
    params:   dict in PyTorch nn.Linear convention (W: (out, in), b: (out,))
    returns:  (E,) float32 edge scores

    Note: matmul operands default to bfloat16 (f32 accumulation).  Pass
    input_dtype=jnp.float32 for bit-faithful comparison against the f32
    PyTorch reference.
    """
    if mtype not in ("rm", "rrm"):
        raise ValueError(f"unknown mtype: {mtype}")
    E = src_idx.shape[0]
    N, F = h.shape
    in_itm = jnp.dtype(input_dtype).itemsize

    # Edge-tile cap as a function of F: keep double-buffered feature blocks +
    # f32 intermediates inside a v7x-safe budget for large F.
    per_row_bytes = F * (4 * in_itm + 16)
    tile_cap = max(128, (20 * 2 ** 20 // per_row_bytes) // 128 * 128)
    tile, n_tiles, e_pad = _choose_tiling(E, min(int(tile_e), tile_cap))

    # ---- gather endpoint features with padded *indices* (never pad (E, F)
    # ---- feature data through HBM).
    pad = e_pad - E
    src_p = jnp.pad(src_idx, (0, pad)) if pad else src_idx
    dst_p = jnp.pad(dst_idx, (0, pad)) if pad else dst_idx
    hc = h.astype(input_dtype)
    h_src = jnp.take(hc, src_p, axis=0)                   # (e_pad, F)
    h_dst = jnp.take(hc, dst_p, axis=0)                   # (e_pad, F)

    # ---- weights: W1^T in matmul dtype (stacked when F is lane-aligned),
    # ---- biases in f32, final 1-wide layer as an (8, F) tile + SMEM scalar.
    fuse_k = (F % 128 == 0)
    w1_t = jnp.asarray(params["W1_w"]).T.astype(input_dtype)        # (2F, F)
    b1 = jnp.asarray(params["W1_b"]).astype(jnp.float32).reshape(1, F)
    weight_args = [w1_t] if fuse_k else [w1_t[:F], w1_t[F:]]
    weight_args.append(b1)
    if mtype == "rm":
        w2 = jnp.asarray(params["W2_w"]).T.astype(input_dtype)      # (F, F)
        b2 = jnp.asarray(params["W2_b"]).astype(jnp.float32).reshape(1, F)
        weight_args += [w2, b2]
        wl = jnp.asarray(params["W3_w"]).reshape(1, F)
        bl = jnp.asarray(params["W3_b"]).astype(jnp.float32).reshape(1)
    else:  # 'rrm'
        wl = jnp.asarray(params["W2_w"]).reshape(1, F)
        bl = jnp.asarray(params["W2_b"]).astype(jnp.float32).reshape(1)
    wl = jnp.pad(wl, ((0, 7), (0, 0))).astype(input_dtype)          # (8, F)
    weight_args += [wl, bl]

    # ---- specs: weights/biases use constant index maps (fetched once).
    feat_spec = pl.BlockSpec((tile, F), lambda i: (i, 0))

    def _full_vmem(a):
        return pl.BlockSpec(a.shape, lambda i, nd=a.ndim: (0,) * nd)

    weight_specs = [_full_vmem(a) for a in weight_args[:-1]]
    weight_specs.append(pl.BlockSpec(memory_space=pltpu.MemorySpace.SMEM))
    out_spec = pl.BlockSpec((1, 1, tile), lambda i: (i, 0, 0))
    out_shape = jax.ShapeDtypeStruct((n_tiles, 1, tile), jnp.float32)

    # ---- VMEM budget: set a limit only when the estimated working set
    # ---- exceeds the smallest platform default (16 MiB on v5e); floor 32 MiB
    # ---- (never below the v6e/v7x default), cap 48 MiB (v7x headroom).
    w_bytes = sum(int(a.size) * a.dtype.itemsize for a in weight_args)
    vmem_needed = (2 * 2 * tile * F * in_itm          # double-buffered hs/hd
                   + 2 * tile * 4                     # double-buffered out row
                   + 2 * w_bytes                      # resident weights (x2)
                   + tile * 4 * F * 4)                # f32 temporaries x/z1/z2
    vmem_limit = None
    if vmem_needed * 5 // 4 > 16 * 2 ** 20:
        vmem_limit = int(min(48 * 2 ** 20,
                             max(32 * 2 ** 20, vmem_needed * 3 // 2)))
    cparams = pltpu.CompilerParams(dimension_semantics=("parallel",),
                                   vmem_limit_bytes=vmem_limit)

    layer_flops = (2 * (2 * F) * F
                   + (2 * F * F if mtype == "rm" else 0)
                   + 2 * F * 8)
    cost = pl.CostEstimate(
        flops=int(e_pad) * int(layer_flops),
        transcendentals=0,
        bytes_accessed=int(2 * e_pad * F * in_itm + e_pad * 4 + w_bytes))

    scores = pl.pallas_call(
        _make_kernel(mtype, fuse_k),
        out_shape=out_shape,
        grid_spec=pltpu.PrefetchScalarGridSpec(
            num_scalar_prefetch=0,
            grid=(n_tiles,),
            in_specs=[feat_spec, feat_spec] + weight_specs,
            out_specs=out_spec),
        compiler_params=cparams,
        cost_estimate=cost,
    )(h_src, h_dst, *weight_args)

    return scores.reshape(-1)[:E]                      # drop padding, squeeze


# ---------------------------------------------------------------------------
# Pure-JAX reference (mirrors the PyTorch forward exactly)
# ---------------------------------------------------------------------------
def mlp_predictor_reference(h, src_idx, dst_idx, params, mtype="rm"):
    x = jnp.concatenate([h[src_idx], h[dst_idx]], axis=1)
    lin = lambda v, w, b: v @ w.T + b
    if mtype == "rrm":
        z = jax.nn.relu(lin(x, params["W1_w"], params["W1_b"]))
        return lin(z, params["W2_w"], params["W2_b"])[:, 0]
    z = jax.nn.relu(lin(x, params["W1_w"], params["W1_b"]))
    z = jax.nn.relu(lin(z, params["W2_w"], params["W2_b"]))
    return lin(z, params["W3_w"], params["W3_b"])[:, 0]


def _init_params(key, h_feats, mtype):
    # Deterministic synthetic init (nn.Linear shapes: W (out, in), b (out,)).
    ks = jax.random.split(key, 6)
    scale = 0.1
    p = {
        "W1_w": scale * jax.random.normal(ks[0], (h_feats, 2 * h_feats), jnp.float32),
        "W1_b": scale * jax.random.normal(ks[1], (h_feats,), jnp.float32),
    }
    if mtype == "rrm":
        p["W2_w"] = scale * jax.random.normal(ks[2], (1, h_feats), jnp.float32)
        p["W2_b"] = scale * jax.random.normal(ks[3], (1,), jnp.float32)
    else:  # 'rm'
        p["W2_w"] = scale * jax.random.normal(ks[2], (h_feats, h_feats), jnp.float32)
        p["W2_b"] = scale * jax.random.normal(ks[3], (h_feats,), jnp.float32)
        p["W3_w"] = scale * jax.random.normal(ks[4], (1, h_feats), jnp.float32)
        p["W3_b"] = scale * jax.random.normal(ks[5], (1,), jnp.float32)
    return p


# ---------------------------------------------------------------------------
if __name__ == "__main__":
    keys = jax.random.split(jax.random.PRNGKey(0), 10)
    ok = True

    # Case 1: small F (split-K path), both mtypes, f32-exact and bf16 paths.
    h_feats, num_nodes, num_edges = 32, 16, 64
    h = jax.random.normal(keys[0], (num_nodes, h_feats), jnp.float32)
    src = jax.random.randint(keys[1], (num_edges,), 0, num_nodes, jnp.int32)
    dst = jax.random.randint(keys[2], (num_edges,), 0, num_nodes, jnp.int32)
    for mtype, kp in (("rm", keys[3]), ("rrm", keys[4])):
        params = _init_params(kp, h_feats, mtype)
        ref = mlp_predictor_reference(h, src, dst, params, mtype=mtype)

        out32 = jax.block_until_ready(
            mlp_predictor_forward(h, src, dst, params, mtype=mtype,
                                  input_dtype=jnp.float32))
        ok &= out32.shape == (num_edges,)
        ok &= bool(jnp.allclose(out32, ref, atol=1e-4, rtol=1e-4))

        outbf = jax.block_until_ready(
            mlp_predictor_forward(h, src, dst, params, mtype=mtype))
        ok &= outbf.shape == (num_edges,)
        ok &= bool(jnp.allclose(outbf, ref, atol=1e-1, rtol=1e-1))

    # Case 2: lane-aligned F (fused K=2F path), multi-tile grid with padding.
    h_feats2, num_nodes2, num_edges2 = 128, 16, 300
    h2 = jax.random.normal(keys[5], (num_nodes2, h_feats2), jnp.float32)
    src2 = jax.random.randint(keys[6], (num_edges2,), 0, num_nodes2, jnp.int32)
    dst2 = jax.random.randint(keys[7], (num_edges2,), 0, num_nodes2, jnp.int32)
    params2 = _init_params(keys[8], h_feats2, "rm")
    ref2 = mlp_predictor_reference(h2, src2, dst2, params2, mtype="rm")

    out2 = jax.block_until_ready(
        mlp_predictor_forward(h2, src2, dst2, params2, mtype="rm",
                              input_dtype=jnp.float32))
    ok &= out2.shape == (num_edges2,)
    ok &= bool(jnp.allclose(out2, ref2, atol=1e-4, rtol=1e-4))

    out2bf = jax.block_until_ready(
        mlp_predictor_forward(h2, src2, dst2, params2, mtype="rm", tile_e=128))
    ok &= out2bf.shape == (num_edges2,)
    ok &= bool(jnp.allclose(out2bf, ref2, atol=1e-1, rtol=1e-1))

    if ok:
        print("KERNEL_OK")
    else:
        print("MISMATCH")
</pallas_src>

<mosaic_0001>
module attributes {stable_mosaic.version = 11 : i64} {
  func.func @kernel(%arg0: i32, %arg1: memref<128x32xf32, #tpu.memory_space<vmem>>, %arg2: memref<128x32xf32, #tpu.memory_space<vmem>>, %arg3: memref<32x32xf32, #tpu.memory_space<vmem>>, %arg4: memref<32x32xf32, #tpu.memory_space<vmem>>, %arg5: memref<1x32xf32, #tpu.memory_space<vmem>>, %arg6: memref<32x32xf32, #tpu.memory_space<vmem>>, %arg7: memref<1x32xf32, #tpu.memory_space<vmem>>, %arg8: memref<8x32xf32, #tpu.memory_space<vmem>>, %arg9: memref<1xf32, #tpu.memory_space<smem>>, %arg10: memref<1x1x128xf32, #tpu.memory_space<vmem>>) attributes {dimension_semantics = [#tpu.dimension_semantics<parallel>], iteration_bounds = array<i64: 1>, scalar_prefetch = 0 : i64, scratch_operands = 0 : i64, tpu.core_type = #tpu.core_type<tc>, window_params = [{transform_indices = @transform_0, window_bounds = array<i64: 128, 32>}, {transform_indices = @transform_1, window_bounds = array<i64: 128, 32>}, {pipeline_mode = #tpu.pipeline_mode<synchronous>, transform_indices = @transform_2, window_bounds = array<i64: 32, 32>}, {pipeline_mode = #tpu.pipeline_mode<synchronous>, transform_indices = @transform_3, window_bounds = array<i64: 32, 32>}, {pipeline_mode = #tpu.pipeline_mode<synchronous>, transform_indices = @transform_4, window_bounds = array<i64: 1, 32>}, {pipeline_mode = #tpu.pipeline_mode<synchronous>, transform_indices = @transform_5, window_bounds = array<i64: 32, 32>}, {pipeline_mode = #tpu.pipeline_mode<synchronous>, transform_indices = @transform_6, window_bounds = array<i64: 1, 32>}, {pipeline_mode = #tpu.pipeline_mode<synchronous>, transform_indices = @transform_7, window_bounds = array<i64: 8, 32>}, {transform_indices = @transform_8, window_bounds = array<i64: 1>}, {transform_indices = @transform_9, window_bounds = array<i64: 1, 1, 128>}]} {
    %c0 = arith.constant 0 : index
    %c0_0 = arith.constant 0 : index
    %0 = vector.load %arg1[%c0, %c0_0] : memref<128x32xf32, #tpu.memory_space<vmem>>, vector<128x32xf32>
    %c0_1 = arith.constant 0 : index
    %c0_2 = arith.constant 0 : index
    %1 = vector.load %arg3[%c0_1, %c0_2] : memref<32x32xf32, #tpu.memory_space<vmem>>, vector<32x32xf32>
    %cst = arith.constant dense<0.000000e+00> : vector<128x32xf32>
    %2 = tpu.matmul %0, %1, %cst {dimension_numbers = #tpu.dot_dimension_numbers<[1], [0], [0], [1], [0, 0, 1, 1], [], []>} : vector<128x32xf32>, vector<32x32xf32>, vector<128x32xf32> -> vector<128x32xf32>
    %c0_3 = arith.constant 0 : index
    %c0_4 = arith.constant 0 : index
    %3 = vector.load %arg2[%c0_3, %c0_4] : memref<128x32xf32, #tpu.memory_space<vmem>>, vector<128x32xf32>
    %c0_5 = arith.constant 0 : index
    %c0_6 = arith.constant 0 : index
    %4 = vector.load %arg4[%c0_5, %c0_6] : memref<32x32xf32, #tpu.memory_space<vmem>>, vector<32x32xf32>
    %cst_7 = arith.constant dense<0.000000e+00> : vector<128x32xf32>
    %5 = tpu.matmul %3, %4, %cst_7 {dimension_numbers = #tpu.dot_dimension_numbers<[1], [0], [0], [1], [0, 0, 1, 1], [], []>} : vector<128x32xf32>, vector<32x32xf32>, vector<128x32xf32> -> vector<128x32xf32>
    %6 = arith.addf %2, %5 : vector<128x32xf32>
    %c0_8 = arith.constant 0 : index
    %c0_9 = arith.constant 0 : index
    %7 = vector.load %arg5[%c0_8, %c0_9] : memref<1x32xf32, #tpu.memory_space<vmem>>, vector<1x32xf32>
    %8 = vector.broadcast %7 : vector<1x32xf32> to vector<128x32xf32>
    %9 = arith.addf %6, %8 : vector<128x32xf32>
    %cst_10 = arith.constant 0.000000e+00 : f32
    %10 = vector.broadcast %cst_10 : f32 to vector<128x32xf32>
    %11 = arith.maximumf %9, %10 : vector<128x32xf32>
    %c0_11 = arith.constant 0 : index
    %c0_12 = arith.constant 0 : index
    %12 = vector.load %arg6[%c0_11, %c0_12] : memref<32x32xf32, #tpu.memory_space<vmem>>, vector<32x32xf32>
    %cst_13 = arith.constant dense<0.000000e+00> : vector<128x32xf32>
    %13 = tpu.matmul %11, %12, %cst_13 {dimension_numbers = #tpu.dot_dimension_numbers<[1], [0], [0], [1], [0, 0, 1, 1], [], []>} : vector<128x32xf32>, vector<32x32xf32>, vector<128x32xf32> -> vector<128x32xf32>
    %c0_14 = arith.constant 0 : index
    %c0_15 = arith.constant 0 : index
    %14 = vector.load %arg7[%c0_14, %c0_15] : memref<1x32xf32, #tpu.memory_space<vmem>>, vector<1x32xf32>
    %15 = vector.broadcast %14 : vector<1x32xf32> to vector<128x32xf32>
    %16 = arith.addf %13, %15 : vector<128x32xf32>
    %cst_16 = arith.constant 0.000000e+00 : f32
    %17 = vector.broadcast %cst_16 : f32 to vector<128x32xf32>
    %18 = arith.maximumf %16, %17 : vector<128x32xf32>
    %c0_17 = arith.constant 0 : index
    %c0_18 = arith.constant 0 : index
    %19 = vector.load %arg8[%c0_17, %c0_18] : memref<8x32xf32, #tpu.memory_space<vmem>>, vector<8x32xf32>
    %cst_19 = arith.constant dense<0.000000e+00> : vector<8x128xf32>
    %20 = tpu.matmul %19, %18, %cst_19 {dimension_numbers = #tpu.dot_dimension_numbers<[1], [1], [0], [0], [0, 0, 1, 0], [], []>} : vector<8x32xf32>, vector<128x32xf32>, vector<8x128xf32> -> vector<8x128xf32>
    %21 = vector.extract_strided_slice %20 {offsets = [0, 0], sizes = [1, 128], strides = [1, 1]} : vector<8x128xf32> to vector<1x128xf32>
    %c0_20 = arith.constant 0 : index
    %22 = memref.load %arg9[%c0_20] : memref<1xf32, #tpu.memory_space<smem>>
    %23 = vector.broadcast %22 : f32 to vector<1x128xf32>
    %24 = arith.addf %21, %23 : vector<1x128xf32>
    %c0_21 = arith.constant 0 : index
    %c0_22 = arith.constant 0 : index
    %c0_23 = arith.constant 0 : index
    %25 = vector.load %arg10[%c0_21, %c0_22, %c0_23] : memref<1x1x128xf32, #tpu.memory_space<vmem>>, vector<1x1x128xf32>
    %26 = vector.shape_cast %25 : vector<1x1x128xf32> to vector<1x128xf32>
    %27 = vector.shape_cast %24 : vector<1x128xf32> to vector<1x1x128xf32>
    tpu.vector_store %arg10[%c0_21, %c0_22, %c0_23], %27 {strides = array<i32>} : memref<1x1x128xf32, #tpu.memory_space<vmem>>, vector<1x1x128xf32>,
    return
  }
  func.func @transform_0(%arg0: i32) -> (i32, i32) {
    %c0_i32 = arith.constant 0 : i32
    %c0_i32_0 = arith.constant 0 : i32
    return %arg0, %c0_i32 : i32, i32
  }
  func.func @transform_1(%arg0: i32) -> (i32, i32) {
    %c0_i32 = arith.constant 0 : i32
    %c0_i32_0 = arith.constant 0 : i32
    return %arg0, %c0_i32 : i32, i32
  }
  func.func @transform_2(%arg0: i32) -> (i32, i32) {
    %c0_i32 = arith.constant 0 : i32
    %c0_i32_0 = arith.constant 0 : i32
    %c0_i32_1 = arith.constant 0 : i32
    return %c0_i32, %c0_i32_0 : i32, i32
  }
  func.func @transform_3(%arg0: i32) -> (i32, i32) {
    %c0_i32 = arith.constant 0 : i32
    %c0_i32_0 = arith.constant 0 : i32
    %c0_i32_1 = arith.constant 0 : i32
    return %c0_i32, %c0_i32_0 : i32, i32
  }
  func.func @transform_4(%arg0: i32) -> (i32, i32) {
    %c0_i32 = arith.constant 0 : i32
    %c0_i32_0 = arith.constant 0 : i32
    %c0_i32_1 = arith.constant 0 : i32
    return %c0_i32, %c0_i32_0 : i32, i32
  }
  func.func @transform_5(%arg0: i32) -> (i32, i32) {
    %c0_i32 = arith.constant 0 : i32
    %c0_i32_0 = arith.constant 0 : i32
    %c0_i32_1 = arith.constant 0 : i32
    return %c0_i32, %c0_i32_0 : i32, i32
  }
  func.func @transform_6(%arg0: i32) -> (i32, i32) {
    %c0_i32 = arith.constant 0 : i32
    %c0_i32_0 = arith.constant 0 : i32
    %c0_i32_1 = arith.constant 0 : i32
    return %c0_i32, %c0_i32_0 : i32, i32
  }
  func.func @transform_7(%arg0: i32) -> (i32, i32) {
    %c0_i32 = arith.constant 0 : i32
    %c0_i32_0 = arith.constant 0 : i32
    %c0_i32_1 = arith.constant 0 : i32
    return %c0_i32, %c0_i32_0 : i32, i32
  }
  func.func @transform_8(%arg0: i32) -> i32 {
    %c0_i32 = arith.constant 0 : i32
    %c0_i32_0 = arith.constant 0 : i32
    return %c0_i32 : i32
  }
  func.func @transform_9(%arg0: i32) -> (i32, i32, i32) {
    %c0_i32 = arith.constant 0 : i32
    %c0_i32_0 = arith.constant 0 : i32
    %c0_i32_1 = arith.constant 0 : i32
    return %arg0, %c0_i32, %c0_i32_0 : i32, i32, i32
  }
}

</mosaic_0001>

<bundles_post_ra>
// kernel: mlp_predictor_forward.1
= control target key start
LH: loop header
LB: loop body
LE: loop exit
PB: predicated region body
PF: predicated region fallthrough
CT: control target
= control target key end

     0   :  { %vm73_vm0 = vcmask 261120   ;;  %vm1127_vm1 = vmmov 0   ;;  %s1434_s3 = inlined_call_operand.vmem [shape: f32[32,32], index: 3, kind: input, shape index: {}]   ;;  %s1435_s2 = inlined_call_operand.vmem [shape: f32[32,32], index: 2, kind: input, shape index: {}]   ;;  %s1436_s1 = inlined_call_operand.vmem [shape: f32[128,32], index: 1, kind: input, shape index: {}]   ;;  %s1437_s0 = inlined_call_operand.vmem [shape: f32[128,32], index: 0, kind: input, shape index: {}]   ;;  %s1438_s5 = inlined_call_operand.vmem [shape: f32[32,32], index: 5, kind: input, shape index: {}]   ;;  %s1439_s4 = inlined_call_operand.vmem [shape: f32[1,32], index: 4, kind: input, shape index: {}]   ;;  %s1440_s6 = inlined_call_operand.vmem [shape: f32[1,32], index: 6, kind: input, shape index: {}]   ;;  %s1441_s7 = inlined_call_operand.vmem [shape: f32[8,32], index: 7, kind: input, shape index: {}]   ;;  %s1442_s8 = inlined_call_operand.<no memory space> [shape: f32[1], index: 8, kind: input, shape index: {}]   ;;  %s1443_s9 = inlined_call_operand.vmem [shape: f32[1,1,128], index: 9, kind: output, shape index: {}]  }
   0x1   :  { %v72_v0 = vld [vmem:[%s1434_s3 + $0x18] sm:$0xff]  ;;  %v71_v2 = vld [vmem:[%s1434_s3 + $0x10] sm:$0xff]  ;;  %v70_v4 = vld [vmem:[%s1434_s3 + $0x8] sm:$0xff] }
   0x2   :  { %v52_v1 = vld [vmem:[%s1435_s2 + $0x18] sm:$0xff]  ;;  %993 = vmatprep.subr.mxu0 %v72_v0  ;;  %v51_v3 = vld [vmem:[%s1435_s2 + $0x10] sm:$0xff]  ;;  %v50_v5 = vld [vmem:[%s1435_s2 + $0x8] sm:$0xff] }
   0x3   :  { %1025 = vmatprep.subr.mxu1 %v52_v1  ;;  %994 = vmatpush3.msra.mxu0 %v72_v0  ;;  %v69_v6 = vld [vmem:[%s1434_s3] sm:$0xff]  ;;  %v54_v10 = vld [vmem:[%s1436_s1 + $0x8] sm:$0xff]  ;;  %v55_v12 = vld [vmem:[%s1436_s1 + $0x10] sm:$0xff] }
   0x4   :  { %1026 = vmatpush3.msra.mxu1 %v52_v1  ;;  %995 = vmatprep.subr.mxu0 %v71_v2  ;;  %v49_v7 = vld [vmem:[%s1435_s2] sm:$0xff]  ;;  %v34_v11 = vld [vmem:[%s1437_s0 + $0x8] sm:$0xff]  ;;  %v35_v13 = vld [vmem:[%s1437_s0 + $0x10] sm:$0xff] }
   0x5   :  { %1027 = vmatprep.subr.mxu1 %v51_v3  ;;  %996 = vmatpush3.msra.mxu0 %v71_v2  ;;  %v53_v8 = vld [vmem:[%s1436_s1] sm:$0xff]  ;;  %v56_v14 = vld [vmem:[%s1436_s1 + $0x18] sm:$0xff]  ;;  %v58_v19 = vld [vmem:[%s1436_s1 + $0x28] sm:$0xff] }
   0x6   :  { %1028 = vmatpush3.msra.mxu1 %v51_v3  ;;  %997 = vmatprep.subr.mxu0 %v70_v4  ;;  %v33_v9 = vld [vmem:[%s1437_s0] sm:$0xff]  ;;  %v36_v15 = vld [vmem:[%s1437_s0 + $0x18] sm:$0xff]  ;;  %v38_v20 = vld [vmem:[%s1437_s0 + $0x28] sm:$0xff] }
   0x7   :  { %1029 = vmatprep.subr.mxu1 %v50_v5  ;;  %998 = vmatpush3.msra.mxu0 %v70_v4  ;;  %v57_v16 = vld [vmem:[%s1436_s1 + $0x20] sm:$0xff]  ;;  %v502_v18 = vld [vmem:[%s1438_s5 + $0x18] sm:$0xff]  ;;  %v59_v21 = vld [vmem:[%s1436_s1 + $0x30] sm:$0xff] }
   0x8   :  { %1030 = vmatpush3.msra.mxu1 %v50_v5  ;;  %999 = vmatprep.subr.mxu0 %v69_v6  ;;  %v37_v17 = vld [vmem:[%s1437_s0 + $0x20] sm:$0xff]  ;;  %v39_v22 = vld [vmem:[%s1437_s0 + $0x30] sm:$0xff]  ;;  %v60_v24 = vld [vmem:[%s1436_s1 + $0x38] sm:$0xff] }
   0x9   :  { %1031 = vmatprep.subr.mxu1 %v49_v7  ;;  %1000 = vmatpush3.msra.mxu0 %v69_v6  ;;  %v501_v23 = vld [vmem:[%s1438_s5 + $0x10] sm:$0xff]  ;;  %v40_v25 = vld [vmem:[%s1437_s0 + $0x38] sm:$0xff]  ;;  %v61_v26 = vld [vmem:[%s1436_s1 + $0x40] sm:$0xff] }
   0xa   :  { %1001 = vmatprep.mubr.msk.f32.mxu0 %vm73_vm0, %v53_v8  ;;  %1032 = vmatpush3.msra.mxu1 %v49_v7  ;;  %v41_v27 = vld [vmem:[%s1437_s0 + $0x40] sm:$0xff]  ;;  %v500_v28 = vld [vmem:[%s1438_s5 + $0x8] sm:$0xff]  ;;  %v63_v31 = vld [vmem:[%s1436_s1 + $0x50] sm:$0xff] }
   0xb   :  { %1033 = vmatprep.mubr.msk.f32.mxu1 %vm73_vm0, %v33_v9  ;;  %1002 = vmatmul.mubr.msk.f32.vlgmr.msra.gmra.mxu0 %vm73_vm0, %v54_v10  ;;  %v62_v29 = vld [vmem:[%s1436_s1 + $0x48] sm:$0xff]  ;;  %v43_v32 = vld [vmem:[%s1437_s0 + $0x50] sm:$0xff]  ;;  %v64_v33 = vld [vmem:[%s1436_s1 + $0x58] sm:$0xff] }
   0xc   :  { %1034 = vmatmul.mubr.msk.f32.vlgmr.msra.gmra.mxu1 %vm73_vm0, %v34_v11  ;;  %1004 = vmatprep.mubr.msk.f32.mxu0 %vm73_vm0, %v55_v12  ;;  %v42_v30 = vld [vmem:[%s1437_s0 + $0x48] sm:$0xff]  ;;  %v44_v34 = vld [vmem:[%s1437_s0 + $0x58] sm:$0xff]  ;;  %v65_v35 = vld [vmem:[%s1436_s1 + $0x60] sm:$0xff] }
   0xd   :  { %1036 = vmatprep.mubr.msk.f32.mxu1 %vm73_vm0, %v35_v13  ;;  %1057 = vmatprep.subr.mxu0 %v502_v18  ;;  %v45_v36 = vld [vmem:[%s1437_s0 + $0x60] sm:$0xff]  ;;  %v66_v37 = vld [vmem:[%s1436_s1 + $0x68] sm:$0xff]  ;;  %v67_v39 = vld [vmem:[%s1436_s1 + $0x70] sm:$0xff] }
   0xe   :  { %1058 = vmatpush3.msra.mxu0 %v502_v18  ;;  %v46_v38 = vld [vmem:[%s1437_s0 + $0x68] sm:$0xff]  ;;  %v47_v40 = vld [vmem:[%s1437_s0 + $0x70] sm:$0xff]  ;;  %v68_v41 = vld [vmem:[%s1436_s1 + $0x78] sm:$0xff] }
   0xf   :  { %1005 = vmatmul.mubr.msk.f32.gmra.mxu0 %vm73_vm0, %v56_v14  ;;  %1059 = vmatprep.subr.mxu0 %v501_v23  ;;  %v48_v42 = vld [vmem:[%s1437_s0 + $0x78] sm:$0xff]  ;;  %v499_v43 = vld [vmem:[%s1438_s5] sm:$0xff] }
  0x10   :  { %1037 = vmatmul.mubr.msk.f32.gmra.mxu1 %vm73_vm0, %v36_v15  ;;  %1007 = vmatprep.mubr.msk.f32.mxu0 %vm73_vm0, %v57_v16  ;;  %v1345_v47 = vld [vmem:[%s1439_s4] ss:$0 sm:$0xff] }
  0x11   :  { %1039 = vmatprep.mubr.msk.f32.mxu1 %vm73_vm0, %v37_v17  ;;  %1060 = vmatpush3.msra.mxu0 %v501_v23 }
  0x12   :  { %1061 = vmatprep.subr.mxu0 %v500_v28 }
  0x13   :  { %1008 = vmatmul.mubr.msk.f32.gmra.mxu0 %vm73_vm0, %v58_v19 }
  0x14   :  { %1040 = vmatmul.mubr.msk.f32.gmra.mxu1 %vm73_vm0, %v38_v20  ;;  %1010 = vmatprep.mubr.msk.f32.mxu0 %vm73_vm0, %v59_v21 }
  0x15   :  { %1042 = vmatprep.mubr.msk.f32.mxu1 %vm73_vm0, %v39_v22  ;;  %1062 = vmatpush3.msra.mxu0 %v500_v28 }
  0x16   :  { %1063 = vmatprep.subr.mxu0 %v499_v43 }
  0x17   :  { %1011 = vmatmul.mubr.msk.f32.gmra.mxu0 %vm73_vm0, %v60_v24 }
  0x18   :  { %1043 = vmatmul.mubr.msk.f32.gmra.mxu1 %vm73_vm0, %v40_v25  ;;  %1013 = vmatprep.mubr.msk.f32.mxu0 %vm73_vm0, %v61_v26 }
  0x19   :  { %1045 = vmatprep.mubr.msk.f32.mxu1 %vm73_vm0, %v41_v27  ;;  %1064 = vmatpush3.msra.mxu0 %v499_v43 }
  0x1b   :  { %1014 = vmatmul.mubr.msk.f32.gmra.mxu0 %vm73_vm0, %v62_v29 }
  0x1c   :  { %1046 = vmatmul.mubr.msk.f32.gmra.mxu1 %vm73_vm0, %v42_v30  ;;  %1016 = vmatprep.mubr.msk.f32.mxu0 %vm73_vm0, %v63_v31 }
  0x1d   :  { %1048 = vmatprep.mubr.msk.f32.mxu1 %vm73_vm0, %v43_v32 }
  0x1f   :  { %1017 = vmatmul.mubr.msk.f32.gmra.mxu0 %vm73_vm0, %v64_v33 }
  0x20   :  { %1049 = vmatmul.mubr.msk.f32.gmra.mxu1 %vm73_vm0, %v44_v34  ;;  %1019 = vmatprep.mubr.msk.f32.mxu0 %vm73_vm0, %v65_v35 }
  0x21   :  { %1051 = vmatprep.mubr.msk.f32.mxu1 %vm73_vm0, %v45_v36 }
  0x23   :  { %1020 = vmatmul.mubr.msk.f32.gmra.mxu0 %vm73_vm0, %v66_v37 }
  0x24   :  { %1052 = vmatmul.mubr.msk.f32.gmra.mxu1 %vm73_vm0, %v46_v38  ;;  %1022 = vmatprep.mubr.msk.f32.mxu0 %vm73_vm0, %v67_v39 }
  0x25   :  { %1054 = vmatprep.mubr.msk.f32.mxu1 %vm73_vm0, %v47_v40 }
  0x27   :  { %1023 = vmatmul.mubr.msk.f32.gmra.mxu0 %vm73_vm0, %v68_v41 }
  0x28   :  { %1055 = vmatmul.mubr.msk.f32.gmra.mxu1 %vm73_vm0, %v48_v42 }
  0xcb   :  { %v1003_v44 = vpop.f32.mrf.mxu0 }
  0xcc   :  { %v1035_v45 = vpop.f32.mrf.mxu1 }
  0xcd   :  { %v387_v46 = vadd.f32 %v1035_v45, %v1003_v44  ;;  %v188_v48 = vpop.f32.mrf.mxu0 }
  0xce   :  { %v381_v49 = vpop.f32.mrf.mxu1 }
  0xcf   :  { %v382_v50 = vadd.f32 %v381_v49, %v188_v48  ;;  %v468_v51 = vadd.f32 %v1345_v47, %v387_v46  ;;  %v1006_v52 = vpop.f32.mrf.mxu0 }
  0xd0   :  { %v1038_v53 = vpop.f32.mrf.mxu1 }
  0xd1   :  { %v467_v54 = vadd.f32 %v1345_v47, %v382_v50  ;;  %v397_v55 = vadd.f32 %v1038_v53, %v1006_v52  ;;  %v198_v56 = vpop.f32.mrf.mxu0  ;;  %v484_v60 = vmax.f32 %v468_v51, 0.0 }
  0xd2   :  { %v391_v57 = vpop.f32.mrf.mxu1 }
  0xd3   :  { %v483_v58 = vmax.f32 %v467_v54, 0.0  ;;  %v392_v59 = vadd.f32 %v391_v57, %v198_v56  ;;  %v470_v61 = vadd.f32 %v1345_v47, %v397_v55  ;;  %v1009_v62 = vpop.f32.mrf.mxu0 }
  0xd4   :  { %v1041_v63 = vpop.f32.mrf.mxu1 }
  0xd5   :  { %v469_v0 = vadd.f32 %v1345_v47, %v392_v59  ;;  %v407_v1 = vadd.f32 %v1041_v63, %v1009_v62  ;;  %1065 = vmatprep.mubr.msk.f32.mxu0 %vm73_vm0, %v483_v58  ;;  %v208_v2 = vpop.f32.mrf.mxu0  ;;  %v486_v6 = vmax.f32 %v470_v61, 0.0  ;;  %v1126_v62 = vmov 0.0  }
  0xd6   :  { %v401_v3 = vpop.f32.mrf.mxu1  ;;  %1066 = vmatmul.mubr.msk.f32.vlgmr.msra.gmra.mxu0 %vm73_vm0, %v484_v60  ;;  %1089 = vmatprep.subr.mxu1 %v1126_v62 }
  0xd7   :  { %v485_v4 = vmax.f32 %v469_v0, 0.0  ;;  %v402_v5 = vadd.f32 %v401_v3, %v208_v2  ;;  %v472_v7 = vadd.f32 %v1345_v47, %v407_v1  ;;  %v1012_v8 = vpop.f32.mrf.mxu0  ;;  %1121 = vmatprep.mubr.msk.f32.mxu1 %vm1127_vm1, %v1126_v62 }
  0xd8   :  { %v1044_v9 = vpop.f32.mrf.mxu1 }
  0xd9   :  { %v471_v10 = vadd.f32 %v1345_v47, %v402_v5  ;;  %v417_v11 = vadd.f32 %v1044_v9, %v1012_v8  ;;  %1068 = vmatprep.mubr.msk.f32.mxu0 %vm73_vm0, %v485_v4  ;;  %v218_v12 = vpop.f32.mrf.mxu0  ;;  %v488_v16 = vmax.f32 %v472_v7, 0.0 }
  0xda   :  { %v411_v13 = vpop.f32.mrf.mxu1  ;;  %1069 = vmatmul.mubr.msk.f32.gmra.mxu0 %vm73_vm0, %v486_v6 }
  0xdb   :  { %v487_v14 = vmax.f32 %v471_v10, 0.0  ;;  %v412_v15 = vadd.f32 %v411_v13, %v218_v12  ;;  %v474_v17 = vadd.f32 %v1345_v47, %v417_v11  ;;  %v1015_v18 = vpop.f32.mrf.mxu0  ;;  %v882_v12 = vld [vmem:[%s1440_s6] ss:$0 sm:$0xff] }
  0xdc   :  { %v1047_v19 = vpop.f32.mrf.mxu1 }
  0xdd   :  { %v473_v20 = vadd.f32 %v1345_v47, %v412_v15  ;;  %v427_v21 = vadd.f32 %v1047_v19, %v1015_v18  ;;  %1071 = vmatprep.mubr.msk.f32.mxu0 %vm73_vm0, %v487_v14  ;;  %v228_v22 = vpop.f32.mrf.mxu0  ;;  %v490_v26 = vmax.f32 %v474_v17, 0.0 }
  0xde   :  { %v421_v23 = vpop.f32.mrf.mxu1  ;;  %1072 = vmatmul.mubr.msk.f32.gmra.mxu0 %vm73_vm0, %v488_v16 }
  0xdf   :  { %v489_v24 = vmax.f32 %v473_v20, 0.0  ;;  %v422_v25 = vadd.f32 %v421_v23, %v228_v22  ;;  %v476_v27 = vadd.f32 %v1345_v47, %v427_v21  ;;  %v1018_v28 = vpop.f32.mrf.mxu0 }
  0xe0   :  { %v1050_v29 = vpop.f32.mrf.mxu1 }
  0xe1   :  { %v475_v30 = vadd.f32 %v1345_v47, %v422_v25  ;;  %v437_v31 = vadd.f32 %v1050_v29, %v1018_v28  ;;  %1074 = vmatprep.mubr.msk.f32.mxu0 %vm73_vm0, %v489_v24  ;;  %v238_v32 = vpop.f32.mrf.mxu0  ;;  %v492_v36 = vmax.f32 %v476_v27, 0.0 }
  0xe2   :  { %v431_v33 = vpop.f32.mrf.mxu1  ;;  %1075 = vmatmul.mubr.msk.f32.gmra.mxu0 %vm73_vm0, %v490_v26 }
  0xe3   :  { %v491_v34 = vmax.f32 %v475_v30, 0.0  ;;  %v432_v35 = vadd.f32 %v431_v33, %v238_v32  ;;  %v478_v37 = vadd.f32 %v1345_v47, %v437_v31  ;;  %v1021_v38 = vpop.f32.mrf.mxu0 }
  0xe4   :  { %v1053_v39 = vpop.f32.mrf.mxu1 }
  0xe5   :  { %v477_v40 = vadd.f32 %v1345_v47, %v432_v35  ;;  %v447_v41 = vadd.f32 %v1053_v39, %v1021_v38  ;;  %1077 = vmatprep.mubr.msk.f32.mxu0 %vm73_vm0, %v491_v34  ;;  %v248_v42 = vpop.f32.mrf.mxu0  ;;  %v494_v46 = vmax.f32 %v478_v37, 0.0 }
  0xe6   :  { %v441_v43 = vpop.f32.mrf.mxu1  ;;  %1078 = vmatmul.mubr.msk.f32.gmra.mxu0 %vm73_vm0, %v492_v36 }
  0xe7   :  { %v493_v44 = vmax.f32 %v477_v40, 0.0  ;;  %v442_v45 = vadd.f32 %v441_v43, %v248_v42  ;;  %v480_v48 = vadd.f32 %v1345_v47, %v447_v41  ;;  %v1024_v49 = vpop.f32.mrf.mxu0 }
  0xe8   :  { %v1056_v50 = vpop.f32.mrf.mxu1 }
  0xe9   :  { %v479_v51 = vadd.f32 %v1345_v47, %v442_v45  ;;  %v457_v52 = vadd.f32 %v1056_v50, %v1024_v49  ;;  %1080 = vmatprep.mubr.msk.f32.mxu0 %vm73_vm0, %v493_v44  ;;  %v258_v53 = vpop.f32.mrf.mxu0  ;;  %v496_v57 = vmax.f32 %v480_v48, 0.0  ;;  %v719_v48 = vld [vmem:[%s1441_s7] sm:$0xff]  ;;  %v842_v49 = vstv %s1442_s8 }
  0xea   :  { %v451_v54 = vpop.f32.mrf.mxu1  ;;  %1081 = vmatmul.mubr.msk.f32.gmra.mxu0 %vm73_vm0, %v494_v46 }
  0xeb   :  { %v495_v55 = vmax.f32 %v479_v51, 0.0  ;;  %v452_v56 = vadd.f32 %v451_v54, %v258_v53  ;;  %v482_v58 = vadd.f32 %v1345_v47, %v457_v52 }
  0xed   :  { %v481_v59 = vadd.f32 %v1345_v47, %v452_v56  ;;  %1083 = vmatprep.mubr.msk.f32.mxu0 %vm73_vm0, %v495_v55  ;;  %v498_v61 = vmax.f32 %v482_v58, 0.0 }
  0xee   :  { %1084 = vmatmul.mubr.msk.f32.gmra.mxu0 %vm73_vm0, %v496_v57 }
  0xef   :  { %v497_v60 = vmax.f32 %v481_v59, 0.0 }
  0xf1   :  { %1086 = vmatprep.mubr.msk.f32.mxu0 %vm73_vm0, %v497_v60 }
  0xf2   :  { %1087 = vmatmul.mubr.msk.f32.gmra.mxu0 %vm73_vm0, %v498_v61 }
 0x196   :  { %v1381_v63 = vpop.f32.mrf.mxu0 }
 0x197   :  { %v630_v42 = vadd.f32 %v1381_v63, %v882_v12 }
 0x198   :  { %v1383_v0 = vpop.f32.mrf.mxu0 }
 0x199   :  { %v704_v44 = vmax.f32 %v630_v42, 0.0  ;;  %v625_v45 = vadd.f32 %v882_v12, %v1383_v0 }
 0x19a   :  { %v1070_v47 = vpop.f32.mrf.mxu0 }
 0x19b   :  { %v640_v38 = vadd.f32 %v1070_v47, %v882_v12  ;;  %v703_v46 = vmax.f32 %v625_v45, 0.0 }
 0x19c   :  { %v1385_v1 = vpop.f32.mrf.mxu0 }
 0x19d   :  { %v706_v40 = vmax.f32 %v640_v38, 0.0  ;;  %v635_v41 = vadd.f32 %v882_v12, %v1385_v1 }
 0x19e   :  { %v1073_v2 = vpop.f32.mrf.mxu0 }
 0x19f   :  { %v650_v34 = vadd.f32 %v1073_v2, %v882_v12  ;;  %v705_v43 = vmax.f32 %v635_v41, 0.0 }
 0x1a0   :  { %v644_v3 = vpop.f32.mrf.mxu0 }
 0x1a1   :  { %v708_v36 = vmax.f32 %v650_v34, 0.0  ;;  %v645_v37 = vadd.f32 %v882_v12, %v644_v3 }
 0x1a2   :  { %v1076_v4 = vpop.f32.mrf.mxu0 }
 0x1a3   :  { %v660_v30 = vadd.f32 %v1076_v4, %v882_v12  ;;  %v707_v39 = vmax.f32 %v645_v37, 0.0 }
 0x1a4   :  { %v654_v5 = vpop.f32.mrf.mxu0 }
 0x1a5   :  { %v710_v32 = vmax.f32 %v660_v30, 0.0  ;;  %v655_v33 = vadd.f32 %v882_v12, %v654_v5 }
 0x1a6   :  { %v1079_v6 = vpop.f32.mrf.mxu0 }
 0x1a7   :  { %v670_v26 = vadd.f32 %v1079_v6, %v882_v12  ;;  %v709_v35 = vmax.f32 %v655_v33, 0.0 }
 0x1a8   :  { %v664_v7 = vpop.f32.mrf.mxu0 }
 0x1a9   :  { %v712_v28 = vmax.f32 %v670_v26, 0.0  ;;  %v665_v29 = vadd.f32 %v882_v12, %v664_v7 }
 0x1aa   :  { %v1082_v8 = vpop.f32.mrf.mxu0 }
 0x1ab   :  { %v680_v22 = vadd.f32 %v1082_v8, %v882_v12  ;;  %v711_v31 = vmax.f32 %v665_v29, 0.0 }
 0x1ac   :  { %v674_v9 = vpop.f32.mrf.mxu0 }
 0x1ad   :  { %v714_v24 = vmax.f32 %v680_v22, 0.0  ;;  %v675_v25 = vadd.f32 %v882_v12, %v674_v9 }
 0x1ae   :  { %v1085_v10 = vpop.f32.mrf.mxu0 }
 0x1af   :  { %v690_v18 = vadd.f32 %v1085_v10, %v882_v12  ;;  %v713_v27 = vmax.f32 %v675_v25, 0.0 }
 0x1b0   :  { %v684_v11 = vpop.f32.mrf.mxu0 }
 0x1b1   :  { %v716_v20 = vmax.f32 %v690_v18, 0.0  ;;  %v685_v21 = vadd.f32 %v882_v12, %v684_v11 }
 0x1b2   :  { %v1088_v13 = vpop.f32.mrf.mxu0 }
 0x1b3   :  { %v700_v14 = vadd.f32 %v1088_v13, %v882_v12  ;;  %v715_v23 = vmax.f32 %v685_v21, 0.0 }
 0x1b4   :  { %v694_v15 = vpop.f32.mrf.mxu0 }
 0x1b5   :  { %v718_v16 = vmax.f32 %v700_v14, 0.0  ;;  %v695_v17 = vadd.f32 %v882_v12, %v694_v15 }
 0x1b7   :  { %1090 = vmatpush3.xpose.msk.msra.mxu1 %vm73_vm0, %v718_v16  ;;  %v717_v19 = vmax.f32 %v695_v17, 0.0 }
 0x1b8   :  { %1091 = vmatprep.subr.mxu1 %v1126_v62 }
 0x1bb   :  { %1092 = vmatpush3.xpose.msk.msra.mxu1 %vm73_vm0, %v717_v19 }
 0x1bc   :  { %1093 = vmatprep.subr.mxu1 %v1126_v62 }
 0x1bf   :  { %1094 = vmatpush3.xpose.msk.msra.mxu1 %vm73_vm0, %v716_v20 }
 0x1c0   :  { %1095 = vmatprep.subr.mxu1 %v1126_v62 }
 0x1c3   :  { %1096 = vmatpush3.xpose.msk.msra.mxu1 %vm73_vm0, %v715_v23 }
 0x1c4   :  { %1097 = vmatprep.subr.mxu1 %v1126_v62 }
 0x1c7   :  { %1098 = vmatpush3.xpose.msk.msra.mxu1 %vm73_vm0, %v714_v24 }
 0x1c8   :  { %1099 = vmatprep.subr.mxu1 %v1126_v62 }
 0x1cb   :  { %1100 = vmatpush3.xpose.msk.msra.mxu1 %vm73_vm0, %v713_v27 }
 0x1cc   :  { %1101 = vmatprep.subr.mxu1 %v1126_v62 }
 0x1cf   :  { %1102 = vmatpush3.xpose.msk.msra.mxu1 %vm73_vm0, %v712_v28 }
 0x1d0   :  { %1103 = vmatprep.subr.mxu1 %v1126_v62 }
 0x1d3   :  { %1104 = vmatpush3.xpose.msk.msra.mxu1 %vm73_vm0, %v711_v31 }
 0x1d4   :  { %1105 = vmatprep.subr.mxu1 %v1126_v62 }
 0x1d7   :  { %1106 = vmatpush3.xpose.msk.msra.mxu1 %vm73_vm0, %v710_v32 }
 0x1d8   :  { %1107 = vmatprep.subr.mxu1 %v1126_v62 }
 0x1db   :  { %1108 = vmatpush3.xpose.msk.msra.mxu1 %vm73_vm0, %v709_v35 }
 0x1dc   :  { %1109 = vmatprep.subr.mxu1 %v1126_v62 }
 0x1df   :  { %1110 = vmatpush3.xpose.msk.msra.mxu1 %vm73_vm0, %v708_v36 }
 0x1e0   :  { %1111 = vmatprep.subr.mxu1 %v1126_v62 }
 0x1e3   :  { %1112 = vmatpush3.xpose.msk.msra.mxu1 %vm73_vm0, %v707_v39 }
 0x1e4   :  { %1113 = vmatprep.subr.mxu1 %v1126_v62 }
 0x1e7   :  { %1114 = vmatpush3.xpose.msk.msra.mxu1 %vm73_vm0, %v706_v40 }
 0x1e8   :  { %1115 = vmatprep.subr.mxu1 %v1126_v62 }
 0x1eb   :  { %1116 = vmatpush3.xpose.msk.msra.mxu1 %vm73_vm0, %v705_v43 }
 0x1ec   :  { %1117 = vmatprep.subr.mxu1 %v1126_v62 }
 0x1ef   :  { %1118 = vmatpush3.xpose.msk.msra.mxu1 %vm73_vm0, %v704_v44 }
 0x1f0   :  { %1119 = vmatprep.subr.mxu1 %v1126_v62 }
 0x1f3   :  { %1120 = vmatpush3.xpose.msk.msra.mxu1 %vm73_vm0, %v703_v46 }
 0x1f6   :  { %1122 = vmatmul.mubr.msk.f32.vlgmr.msra.gmra.mxu1 %vm73_vm0, %v719_v48 }
 0x2b6   :  { %v837_v50 = vpop.f32.mrf.mxu1 }
 0x2b7   :  { %v843_v51 = vadd.f32 %v842_v49, %v837_v50 }
 0x2b8   :  { %v1123_v52 = vpop.f32.mrf.mxu1 }
 0x2b9   :  { %844 = vst [vmem:[%s1443_s9] sm:$0x1] %v843_v51 }

</bundles_post_ra>
